<compile_context>
chip_gen: v5e
topology: v5e:2x2
jax: 0.10.0
libtpu: 0.0.40
codegen_flags: <defaults>
</compile_context>

<pallas_src>
import jax
import jax.numpy as jnp
from jax.experimental import pallas as pl
from jax.experimental.pallas import tpu as pltpu


def _round_up(n, m):
    return ((n + m - 1) // m) * m


def smoking_classifier_kernel(x_ref, w1_ref, w2_ref, w3_ref, b_ref, o_ref):
    h1_dim = w1_ref.shape[1]
    h2_dim = w2_ref.shape[1]
    # Bias segment offsets are 128-lane aligned (see fold_params), so these
    # slices are free regardless of the hidden-layer sizes.
    h2_off = _round_up(h1_dim, 128)
    b3_off = h2_off + _round_up(h2_dim, 128)

    x = x_ref[...]  # (TB, F); f32 or bf16 (producer's dtype)

    # Layer 1: folded Linear(+BN) on the MXU (bf16 inputs, f32 accumulation) -> ReLU.
    # astype is a no-op when x already arrives as bf16.
    h1 = jnp.dot(x.astype(jnp.bfloat16), w1_ref[...],
                 preferred_element_type=jnp.float32)
    h1 = jnp.maximum(h1 + b_ref[:, 0:h1_dim], 0.0)

    # Layer 2: folded Linear(+BN) -> ReLU.
    h2 = jnp.dot(h1.astype(jnp.bfloat16), w2_ref[...],
                 preferred_element_type=jnp.float32)
    h2 = jnp.maximum(h2 + b_ref[:, h2_off:h2_off + h2_dim], 0.0)

    # Output head Linear(H2 -> 1) as a VPU multiply + lane (XLU) reduction instead
    # of a 1-column MXU matmul. Elementwise math kept in f32 (v5e has no bf16 VPU).
    # TODO(synk): if a bundle dump shows the MXU slot has slack and VPU/XLU is the
    # saturating unit at large TB, move this to a 1-column bf16 MXU pass instead.
    w3 = w3_ref[...].astype(jnp.float32)                     # (1, H2)
    b3 = b_ref[:, b3_off:b3_off + 1]                         # (1, 1)
    logits = jnp.sum(h2 * w3, axis=-1, keepdims=True) + b3   # (TB, 1)
    o_ref[...] = jax.nn.sigmoid(logits).astype(o_ref.dtype)


def smoking_classifier_forward(x, folded, *, tile_b=1024):
    """x: (B, F) float32 or bfloat16. folded: dict from fold_params()."""
    B, F = x.shape
    w1, w2, w3, b_packed = folded["w1"], folded["w2"], folded["w3"], folded["b"]

    # Batch tiling:
    #  * small B: one full-batch tile (grid=1), no ragged handling needed;
    #  * larger B: tiles of up to `tile_b` rows, but never fewer than 2 grid
    #    steps so v7x's second TensorCore gets work via dimension_semantics;
    #    VMEM is not a constraint (whole working set << 64 MiB even at TB=2048).
    if B <= 512:
        TB = B
    else:
        TB = min(tile_b, _round_up(pl.cdiv(B, 2), 256))
    num_tiles = pl.cdiv(B, TB)

    # No jnp.pad of x: a ragged last block is handled by Pallas (out-of-range
    # input rows read padding garbage, out-of-range output rows are dropped).
    #
    # TODO(synk): at B >= ~4096 emit a lane-dense (num_tiles, TB) output (batch on
    # lanes, transpose logits in-kernel) to avoid masked 1-lane stores; output is
    # ~2% of traffic so it is second-order at the shapes used here.
    # TODO(synk): if xprof shows exposed x-DMA between grid steps at large TB, add
    # pipeline_mode=pl.Buffered(3) to the x BlockSpec only.
    out = pl.pallas_call(
        smoking_classifier_kernel,
        out_shape=jax.ShapeDtypeStruct((B, 1), jnp.float32),
        grid=(num_tiles,),
        in_specs=[
            pl.BlockSpec((TB, F), lambda i: (i, 0)),       # x: batch-tiled
            pl.BlockSpec(w1.shape, lambda i: (0, 0)),      # weights: constant block,
            pl.BlockSpec(w2.shape, lambda i: (0, 0)),      # stay VMEM-resident
            pl.BlockSpec(w3.shape, lambda i: (0, 0)),
            pl.BlockSpec(b_packed.shape, lambda i: (0, 0)),
        ],
        out_specs=pl.BlockSpec((TB, 1), lambda i: (i, 0)),
        compiler_params=pltpu.CompilerParams(
            dimension_semantics=("parallel",),  # shard batch tiles across TCs (v7x)
        ),
    )(x, w1, w2, w3, b_packed)
    return out


def init_params(key, input_size, hidden_layers):
    """PyTorch-default init: Linear U(-1/sqrt(fan_in), 1/sqrt(fan_in));
       BN gamma=1, beta=0, running_mean=0, running_var=1.
       Linear weights stored transposed as (in_features, out_features)."""
    params = {}
    dims = [input_size] + list(hidden_layers) + [1]
    keys = jax.random.split(key, 2 * (len(dims) - 1))
    for li in range(len(dims) - 1):
        fan_in, fan_out = dims[li], dims[li + 1]
        bound = 1.0 / jnp.sqrt(jnp.float32(fan_in))
        kw, kb = keys[2 * li], keys[2 * li + 1]
        idx = li + 1
        params[f"w{idx}"] = jax.random.uniform(
            kw, (fan_in, fan_out), jnp.float32, -bound, bound)
        params[f"b{idx}"] = jax.random.uniform(
            kb, (1, fan_out), jnp.float32, -bound, bound)
        if li < len(hidden_layers):  # BatchNorm only on hidden layers
            params[f"g{idx}"] = jnp.ones((1, fan_out), jnp.float32)
            params[f"beta{idx}"] = jnp.zeros((1, fan_out), jnp.float32)
            params[f"mu{idx}"] = jnp.zeros((1, fan_out), jnp.float32)
            params[f"var{idx}"] = jnp.ones((1, fan_out), jnp.float32)
    return params


def fold_params(params, eps=1e-5):
    """One-time offline fold of eval-mode BatchNorm into the Linear layers,
       bf16 weight cast, and packing of all biases into one lane vector with
       each segment padded to a 128-lane boundary (keeps in-kernel bias slices
       lane-aligned for any hidden-layer configuration)."""
    def fold(w, b, g, beta, mu, var):
        scale = g * jax.lax.rsqrt(var + eps)          # (1, out)
        return w * scale, (b - mu) * scale + beta

    def pad_lanes(v, width):
        pad = width - v.shape[-1]
        return jnp.pad(v, ((0, 0), (0, pad))) if pad else v

    w1, b1 = fold(params["w1"], params["b1"], params["g1"], params["beta1"],
                  params["mu1"], params["var1"])
    w2, b2 = fold(params["w2"], params["b2"], params["g2"], params["beta2"],
                  params["mu2"], params["var2"])
    w3 = params["w3"].T                                # (1, H2)
    b3 = params["b3"]                                  # (1, 1)
    b_packed = jnp.concatenate(
        [pad_lanes(b1, _round_up(b1.shape[-1], 128)),
         pad_lanes(b2, _round_up(b2.shape[-1], 128)),
         pad_lanes(b3, 128)],
        axis=-1).astype(jnp.float32)
    return {
        "w1": w1.astype(jnp.bfloat16),
        "w2": w2.astype(jnp.bfloat16),
        "w3": w3.astype(jnp.bfloat16),
        "b": b_packed,
    }


def reference_forward(x, params, eps=1e-5):
    """Pure-JAX f32 reference of the PyTorch eval-mode forward (for checking)."""
    h = x @ params["w1"] + params["b1"]
    h = (h - params["mu1"]) * jax.lax.rsqrt(params["var1"] + eps)
    h = h * params["g1"] + params["beta1"]
    h = jnp.maximum(h, 0.0)
    h = h @ params["w2"] + params["b2"]
    h = (h - params["mu2"]) * jax.lax.rsqrt(params["var2"] + eps)
    h = h * params["g2"] + params["beta2"]
    h = jnp.maximum(h, 0.0)
    logits = h @ params["w3"] + params["b3"]
    return jax.nn.sigmoid(logits)


if __name__ == "__main__":
    # input_size = 16 keypoints * 3 (x, y, score) = 48, default hidden layers
    input_size = 48
    hidden_layers = [256, 128]

    key = jax.random.PRNGKey(0)
    kx1, kx2, kp = jax.random.split(key, 3)
    params = init_params(kp, input_size, hidden_layers)
    folded = fold_params(params)   # one-time offline BN fold + bias packing

    # --- Small batch (single full-batch tile, grid=1), f32 input ---
    batch_small = 8
    x_small = jax.random.normal(kx1, (batch_small, input_size), jnp.float32)
    out_small = jax.block_until_ready(smoking_classifier_forward(x_small, folded))
    assert out_small.shape == (batch_small, 1)
    assert bool(jnp.all((out_small >= 0.0) & (out_small <= 1.0)))
    ref_small = reference_forward(x_small, params)
    assert bool(jnp.allclose(out_small, ref_small, atol=5e-2)), (
        f"max abs diff {float(jnp.max(jnp.abs(out_small - ref_small)))}")

    # --- Larger ragged batch (2 grid steps, no pad copy), bf16 input straight
    #     from the producer (no wrapper cast) ---
    batch_big = 600
    x_big = jax.random.normal(kx2, (batch_big, input_size), jnp.bfloat16)
    out_big = jax.block_until_ready(smoking_classifier_forward(x_big, folded))
    assert out_big.shape == (batch_big, 1)
    assert bool(jnp.all((out_big >= 0.0) & (out_big <= 1.0)))
    ref_big = reference_forward(x_big.astype(jnp.float32), params)
    assert bool(jnp.allclose(out_big, ref_big, atol=5e-2)), (
        f"max abs diff {float(jnp.max(jnp.abs(out_big - ref_big)))}")

    print("KERNEL_OK")
</pallas_src>

<mosaic_0001>
module attributes {stable_mosaic.version = 11 : i64} {
  func.func @smoking_classifier_kernel(%arg0: i32, %arg1: memref<8x48xf32, #tpu.memory_space<vmem>>, %arg2: memref<48x256xbf16, #tpu.memory_space<vmem>>, %arg3: memref<256x128xbf16, #tpu.memory_space<vmem>>, %arg4: memref<1x128xbf16, #tpu.memory_space<vmem>>, %arg5: memref<1x512xf32, #tpu.memory_space<vmem>>, %arg6: memref<8x1xf32, #tpu.memory_space<vmem>>) attributes {dimension_semantics = [#tpu.dimension_semantics<parallel>], iteration_bounds = array<i64: 1>, scalar_prefetch = 0 : i64, scratch_operands = 0 : i64, tpu.core_type = #tpu.core_type<tc>, window_params = [{transform_indices = @transform_0, window_bounds = array<i64: 8, 48>}, {pipeline_mode = #tpu.pipeline_mode<synchronous>, transform_indices = @transform_1, window_bounds = array<i64: 48, 256>}, {pipeline_mode = #tpu.pipeline_mode<synchronous>, transform_indices = @transform_2, window_bounds = array<i64: 256, 128>}, {pipeline_mode = #tpu.pipeline_mode<synchronous>, transform_indices = @transform_3, window_bounds = array<i64: 1, 128>}, {pipeline_mode = #tpu.pipeline_mode<synchronous>, transform_indices = @transform_4, window_bounds = array<i64: 1, 512>}, {transform_indices = @transform_5, window_bounds = array<i64: 8, 1>}]} {
    %c0 = arith.constant 0 : index
    %c0_0 = arith.constant 0 : index
    %0 = vector.load %arg1[%c0, %c0_0] : memref<8x48xf32, #tpu.memory_space<vmem>>, vector<8x48xf32>
    %1 = arith.truncf %0 : vector<8x48xf32> to vector<8x48xbf16>
    %c0_1 = arith.constant 0 : index
    %c0_2 = arith.constant 0 : index
    %2 = vector.load %arg2[%c0_1, %c0_2] : memref<48x256xbf16, #tpu.memory_space<vmem>>, vector<48x256xbf16>
    %cst = arith.constant dense<0.000000e+00> : vector<8x256xf32>
    %3 = tpu.matmul %1, %2, %cst {dimension_numbers = #tpu.dot_dimension_numbers<[1], [0], [0], [1], [0, 0, 1, 1], [], []>} : vector<8x48xbf16>, vector<48x256xbf16>, vector<8x256xf32> -> vector<8x256xf32>
    %c0_3 = arith.constant 0 : index
    %c0_4 = arith.constant 0 : index
    %4 = vector.load %arg5[%c0_3, %c0_4] : memref<1x512xf32, #tpu.memory_space<vmem>>, vector<1x256xf32>
    %5 = vector.broadcast %4 : vector<1x256xf32> to vector<8x256xf32>
    %6 = arith.addf %3, %5 : vector<8x256xf32>
    %cst_5 = arith.constant 0.000000e+00 : f32
    %7 = vector.broadcast %cst_5 : f32 to vector<8x256xf32>
    %8 = arith.maximumf %6, %7 : vector<8x256xf32>
    %9 = arith.truncf %8 : vector<8x256xf32> to vector<8x256xbf16>
    %c0_6 = arith.constant 0 : index
    %c0_7 = arith.constant 0 : index
    %10 = vector.load %arg3[%c0_6, %c0_7] : memref<256x128xbf16, #tpu.memory_space<vmem>>, vector<256x128xbf16>
    %cst_8 = arith.constant dense<0.000000e+00> : vector<8x128xf32>
    %11 = tpu.matmul %9, %10, %cst_8 {dimension_numbers = #tpu.dot_dimension_numbers<[1], [0], [0], [1], [0, 0, 1, 1], [], []>} : vector<8x256xbf16>, vector<256x128xbf16>, vector<8x128xf32> -> vector<8x128xf32>
    %c0_9 = arith.constant 0 : index
    %c256 = arith.constant 256 : index
    %12 = vector.load %arg5[%c0_9, %c256] : memref<1x512xf32, #tpu.memory_space<vmem>>, vector<1x128xf32>
    %13 = vector.broadcast %12 : vector<1x128xf32> to vector<8x128xf32>
    %14 = arith.addf %11, %13 : vector<8x128xf32>
    %cst_10 = arith.constant 0.000000e+00 : f32
    %15 = vector.broadcast %cst_10 : f32 to vector<8x128xf32>
    %16 = arith.maximumf %14, %15 : vector<8x128xf32>
    %c0_11 = arith.constant 0 : index
    %c0_12 = arith.constant 0 : index
    %17 = vector.load %arg4[%c0_11, %c0_12] : memref<1x128xbf16, #tpu.memory_space<vmem>>, vector<1x128xbf16>
    %18 = arith.extf %17 : vector<1x128xbf16> to vector<1x128xf32>
    %c0_13 = arith.constant 0 : index
    %c384 = arith.constant 384 : index
    %19 = vector.load %arg5[%c0_13, %c384] : memref<1x512xf32, #tpu.memory_space<vmem>>, vector<1x1xf32>
    %20 = vector.broadcast %18 : vector<1x128xf32> to vector<8x128xf32>
    %21 = arith.mulf %16, %20 : vector<8x128xf32>
    %cst_14 = arith.constant dense<0.000000e+00> : vector<8xf32>
    %22 = vector.multi_reduction <add>, %21, %cst_14 [1] : vector<8x128xf32> to vector<8xf32>
    %23 = vector.shape_cast %22 : vector<8xf32> to vector<8x1xf32>
    %24 = vector.broadcast %19 : vector<1x1xf32> to vector<8x1xf32>
    %25 = arith.addf %23, %24 : vector<8x1xf32>
    %26 = arith.negf %25 : vector<8x1xf32>
    %27 = math.exp %26 : vector<8x1xf32>
    %cst_15 = arith.constant 1.000000e+00 : f32
    %28 = vector.broadcast %cst_15 : f32 to vector<8x1xf32>
    %29 = arith.addf %28, %27 : vector<8x1xf32>
    %30 = arith.divf %28, %29 : vector<8x1xf32>
    %c0_16 = arith.constant 0 : index
    %c0_17 = arith.constant 0 : index
    %31 = vector.load %arg6[%c0_16, %c0_17] : memref<8x1xf32, #tpu.memory_space<vmem>>, vector<8x1xf32>
    tpu.vector_store %arg6[%c0_16, %c0_17], %30 {strides = array<i32>} : memref<8x1xf32, #tpu.memory_space<vmem>>, vector<8x1xf32>,
    return
  }
  func.func @transform_0(%arg0: i32) -> (i32, i32) {
    %c0_i32 = arith.constant 0 : i32
    %c0_i32_0 = arith.constant 0 : i32
    return %arg0, %c0_i32 : i32, i32
  }
  func.func @transform_1(%arg0: i32) -> (i32, i32) {
    %c0_i32 = arith.constant 0 : i32
    %c0_i32_0 = arith.constant 0 : i32
    %c0_i32_1 = arith.constant 0 : i32
    return %c0_i32, %c0_i32_0 : i32, i32
  }
  func.func @transform_2(%arg0: i32) -> (i32, i32) {
    %c0_i32 = arith.constant 0 : i32
    %c0_i32_0 = arith.constant 0 : i32
    %c0_i32_1 = arith.constant 0 : i32
    return %c0_i32, %c0_i32_0 : i32, i32
  }
  func.func @transform_3(%arg0: i32) -> (i32, i32) {
    %c0_i32 = arith.constant 0 : i32
    %c0_i32_0 = arith.constant 0 : i32
    %c0_i32_1 = arith.constant 0 : i32
    return %c0_i32, %c0_i32_0 : i32, i32
  }
  func.func @transform_4(%arg0: i32) -> (i32, i32) {
    %c0_i32 = arith.constant 0 : i32
    %c0_i32_0 = arith.constant 0 : i32
    %c0_i32_1 = arith.constant 0 : i32
    return %c0_i32, %c0_i32_0 : i32, i32
  }
  func.func @transform_5(%arg0: i32) -> (i32, i32) {
    %c0_i32 = arith.constant 0 : i32
    %c0_i32_0 = arith.constant 0 : i32
    return %arg0, %c0_i32 : i32, i32
  }
}

</mosaic_0001>

<bundles_post_ra>
// kernel: tpu_custom_call.1
= control target key start
LH: loop header
LB: loop body
LE: loop exit
PB: predicated region body
PF: predicated region fallthrough
CT: control target
= control target key end

     0   :  { %10 = vsyncpa [#allocation3], 0  ;;  %s641_s0 = inlined_call_operand.hbm [shape: f32[8,48], index: 0, kind: input, shape index: {}]   ;;  %s642_s1 = inlined_call_operand.hbm [shape: bf16[48,256], index: 1, kind: input, shape index: {}]   ;;  %s643_s2 = inlined_call_operand.hbm [shape: bf16[256,128], index: 2, kind: input, shape index: {}]   ;;  %s644_s3 = inlined_call_operand.vmem [shape: bf16[1,128], index: 3, kind: input, shape index: {}]   ;;  %s645_s4 = inlined_call_operand.hbm [shape: f32[1,512], index: 4, kind: input, shape index: {}]   ;;  %s646_s5 = inlined_call_operand.vmem [shape: f32[8,1], index: 5, kind: output, shape index: {}]  }
   0x1   :  { %11 = vsyncpa [#allocation5], 0  ;;  %s28_s20 = sshll.u32 %s642_s1, 4  ;;  %s29_s20 = int_to_ptr.hbm [resolvable:$true] %s28_s20 }
   0x2   :  { %12 = vsyncpa [#allocation8], 0  ;;  %s585_s21 = smov [#allocation4]   ;;  %s18_s25 = sshll.u32 %s641_s0, 4  ;;  %s19_s25 = int_to_ptr.hbm [resolvable:$true] %s18_s25 }
   0x3   :  { %s30_s22 = sshll.u32 %s585_s21, 4  ;;  %s586_s26 = smov 128   ;;  %s31_s22 = int_to_ptr.vmem [resolvable:$true] %s30_s22 }
   0x4   :  { %s587_s27 = smov 8   ;;  %s588_s28 = smov [#allocation2]  }
   0x5   :  { %36 = dma.hbm_to_vmem [thread:$0]  %s29_s20, 768, %s31_s22, [#allocation5], %s586_s26, %s586_s26, %s587_s27  }
   0x6   :  { %s20_s29 = sshll.u32 %s588_s28, 4  ;;  %s41_s7 = sshll.u32 %s643_s2, 4  ;;  %s21_s29 = int_to_ptr.vmem [resolvable:$true] %s20_s29  ;;  %s42_s7 = int_to_ptr.hbm [resolvable:$true] %s41_s7 }
   0x7   :  { %23 = dma.hbm_to_vmem [thread:$0]  %s19_s25, 128, %s21_s29, [#allocation3]  }
   0x8   :  { %s589_s1 = smov [#allocation6]   ;;  %s57_s0 = sshll.u32 %s645_s4, 4  ;;  %s58_s0 = int_to_ptr.hbm [resolvable:$true] %s57_s0 }
   0x9   :  { %s43_s8 = sshll.u32 %s589_s1, 4  ;;  %s590_s11 = smov 64   ;;  %s44_s8 = int_to_ptr.vmem [resolvable:$true] %s43_s8 }
   0xa   :  { %s591_s12 = smov 4   ;;  %s592_s13 = smov [#allocation7]  }
   0xb   :  { %49 = dma.hbm_to_vmem [thread:$0]  %s42_s7, 2048, %s44_s8, [#allocation5], %s590_s11, %s590_s11, %s591_s12  }
   0xc   :  { %s59_s14 = sshll.u32 %s592_s13, 4  ;;  %s60_s14 = int_to_ptr.vmem [resolvable:$true] %s59_s14 }
   0xd   :  { %62 = dma.hbm_to_vmem [thread:$0]  %s58_s0, 64, %s60_s14, [#allocation8]  }
   0xe   :  { %579 = dma.done.wait [#allocation3], 128  }
   0xf   :  { %580 = vsyncadd [#allocation3], 4294967168 }
  0x10   :  { %581 = dma.done.wait [#allocation5], 2816  }
  0x11   :  { %582 = vsyncadd [#allocation5], 4294964480 }
  0x12   :  { %583 = dma.done.wait [#allocation8], 64  }
  0x13   :  { %584 = vsyncadd [#allocation8], 4294967232  ;;  %v374_v0 = vld [vmem:[#allocation4 + $0x20] sm:$0xf]  ;;  %v452_v1 = vld [vmem:[#allocation4 + $0x24] sm:$0xf0] }
  0x14   :  { %v451_v2 = vld [vmem:[#allocation4 + $0x24] sm:$0xf]  ;;  %v375_v3 = vor.u32 %v452_v1, %v374_v0  ;;  %v376_v4 = vld [vmem:[#allocation4 + $0x28] sm:$0xf0]  ;;  %v366_v5 = vld [vmem:[#allocation4 + $0x10] sm:$0xf] }
  0x15   :  { %v450_v6 = vld [vmem:[#allocation4 + $0x14] sm:$0xf0]  ;;  %v379_v7 = vor.u32 %v451_v2, %v376_v4  ;;  %v449_v8 = vld [vmem:[#allocation4 + $0x14] sm:$0xf]  ;;  %v368_v9 = vld [vmem:[#allocation4 + $0x18] sm:$0xf0] }
  0x16   :  { %133 = vmatpush.bf16.msra.mxu0 %v375_v3  ;;  %v367_v10 = vor.u32 %v450_v6, %v366_v5  ;;  %v358_v11 = vld [vmem:[#allocation4] sm:$0xf]  ;;  %v371_v12 = vor.u32 %v449_v8, %v368_v9  ;;  %v448_v13 = vld [vmem:[#allocation4 + $0x4] sm:$0xf0]  ;;  %v447_v16 = vld [vmem:[#allocation4 + $0x4] sm:$0xf] }
  0x17   :  { %146 = vmatpush.bf16.msra.mxu1 %v379_v7  ;;  %v460_v14 = vld [vmem:[#allocation6 + $0x38] sm:$0xff]  ;;  %v459_v18 = vld [vmem:[#allocation6 + $0x30] sm:$0xff]  ;;  %v359_v20 = vor.u32 %v448_v13, %v358_v11  ;;  %v80_v21 = vld [vmem:[#allocation2] sm:$0xff]  ;;  %vm124_vm0 = vcmask 392192   ;;  %vm347_vm4 = vcmask 7168  }
  0x18   :  { %v468_v15 = vld [vmem:[#allocation6 + $0x78] sm:$0xff]  ;;  %290 = vmatpush.bf16.msra.mxu2 %v460_v14  ;;  %v467_v19 = vld [vmem:[#allocation6 + $0x70] sm:$0xff]  ;;  %v81_v23 = vpack.c.bf16 %v80_v21, %v80_v21  ;;  %v458_v24 = vld [vmem:[#allocation6 + $0x28] sm:$0xff] }
  0x19   :  { %v360_v17 = vld [vmem:[#allocation4 + $0x8] sm:$0xf0]  ;;  %303 = vmatpush.bf16.msra.mxu3 %v468_v15  ;;  %v466_v25 = vld [vmem:[#allocation6 + $0x68] sm:$0xff]  ;;  %v457_v26 = vld [vmem:[#allocation6 + $0x20] sm:$0xff] }
  0x1a   :  { %134 = vmatpush.bf16.msra.mxu0 %v367_v10  ;;  %v363_v22 = vor.u32 %v447_v16, %v360_v17  ;;  %v465_v27 = vld [vmem:[#allocation6 + $0x60] sm:$0xff]  ;;  %v456_v28 = vld [vmem:[#allocation6 + $0x18] sm:$0xff]  ;;  %v455_v30 = vld [vmem:[#allocation6 + $0x10] sm:$0xff] }
  0x1b   :  { %147 = vmatpush.bf16.msra.mxu1 %v371_v12  ;;  %v464_v29 = vld [vmem:[#allocation6 + $0x58] sm:$0xff]  ;;  %v463_v31 = vld [vmem:[#allocation6 + $0x50] sm:$0xff]  ;;  %v454_v32 = vld [vmem:[#allocation6 + $0x8] sm:$0xff] }
  0x1c   :  { %291 = vmatpush.bf16.msra.mxu2 %v459_v18  ;;  %v462_v33 = vld [vmem:[#allocation6 + $0x48] sm:$0xff]  ;;  %v453_v34 = vld [vmem:[#allocation6] sm:$0xff] }
  0x1d   :  { %304 = vmatpush.bf16.msra.mxu3 %v467_v19  ;;  %v461_v35 = vld [vmem:[#allocation6 + $0x40] sm:$0xff]  ;;  %v317_v49 = vld [vmem:[%s644_s3] sm:$0x1] }
  0x1e   :  { %135 = vmatpush.bf16.msra.mxu0 %v359_v20  ;;  %v88_v36 = vld [vmem:[#allocation7] sm:$0x3]  ;;  %v477_v50 = vld [vmem:[#allocation7 + $0x2] ss:$0 sm:$0xff]  ;;  %v318_v51 = vunpack.c.l.bf16 %v317_v49  ;;  %v478_v61 = vld [vmem:[#allocation7 + $0x3] ss:$0 sm:$0xff] }
  0x1f   :  { %148 = vmatpush.bf16.msra.mxu1 %v363_v22  ;;  %v90_v37 = vperm.slane %v88_v36, 0  ;;  %v91_v38 = vperm.slane %v88_v36, 1 }
  0x20   :  { %292 = vmatpush.bf16.msra.mxu2 %v458_v24  ;;  %v320_v56 = vperm.slane %v318_v51, 0 }
  0x21   :  { %380 = vmatmul.msk.bf16.vlgmr.msra.gmra.mxu0 %vm124_vm0, %v81_v23  ;;  %305 = vmatpush.bf16.msra.mxu3 %v466_v25 }
  0x22   :  { %381 = vmatmul.msk.bf16.vlgmr.msra.gmra.mxu1 %vm124_vm0, %v81_v23 }
  0x24   :  { %293 = vmatpush.bf16.msra.mxu2 %v457_v26 }
  0x25   :  { %306 = vmatpush.bf16.msra.mxu3 %v465_v27 }
  0x28   :  { %294 = vmatpush.bf16.msra.mxu2 %v456_v28 }
  0x29   :  { %307 = vmatpush.bf16.msra.mxu3 %v464_v29 }
  0x2c   :  { %295 = vmatpush.bf16.msra.mxu2 %v455_v30 }
  0x2d   :  { %308 = vmatpush.bf16.msra.mxu3 %v463_v31 }
  0x30   :  { %296 = vmatpush.bf16.msra.mxu2 %v454_v32 }
  0x31   :  { %309 = vmatpush.bf16.msra.mxu3 %v462_v33 }
  0x34   :  { %297 = vmatpush.bf16.msra.mxu2 %v453_v34 }
  0x35   :  { %310 = vmatpush.bf16.msra.mxu3 %v461_v35 }
  0x9e   :  { %v137_v39 = vpop.f32.mrf.mxu0 }
  0x9f   :  { %v138_v40 = vadd.f32 %v137_v39, %v90_v37  ;;  %v150_v41 = vpop.f32.mrf.mxu1 }
  0xa0   :  { %v151_v42 = vadd.f32 %v150_v41, %v91_v38 }
  0xa1   :  { %v154_v43 = vmax.f32 %v138_v40, 0.0 }
  0xa2   :  { %v155_v44 = vmax.f32 %v151_v42, 0.0 }
  0xa3   :  { %v156_v45 = vpack.c.bf16 %v154_v43, %v154_v43 }
  0xa4   :  { %v157_v46 = vpack.c.bf16 %v155_v44, %v155_v44 }
  0xa5   :  { %298 = vmatmul.bf16.vlgmr.msra.gmra.mxu2 %v156_v45 }
  0xa6   :  { %311 = vmatmul.bf16.vlgmr.msra.gmra.mxu3 %v157_v46  ;;  %v139_v47 = vpop.f32.mrf.mxu0 }
  0xa7   :  { %v152_v48 = vpop.f32.mrf.mxu1 }
 0x128   :  { %v299_v52 = vpop.f32.mrf.mxu2 }
 0x129   :  { %v300_v53 = vadd.f32 %v477_v50, %v299_v52  ;;  %v312_v54 = vpop.f32.mrf.mxu3 }
 0x12b   :  { %v313_v55 = vadd.f32 %v312_v54, %v300_v53 }
 0x12d   :  { %v316_v57 = vmax.f32 %v313_v55, 0.0 }
 0x12f   :  { %v321_v58 = vmul.f32 %v320_v56, %v316_v57 }
 0x130   :  { %v301_v59 = vpop.f32.mrf.mxu2 }
 0x131   :  { %v314_v60 = vpop.f32.mrf.mxu3  ;;  %322 = vadd.xlane.f32.xlu0 %v321_v58 }
 0x1a4   :  { %v323_v62 = vpop.xlane.xlu0 %322 }
 0x1a5   :  { %v327_v63 = vadd.f32 %v478_v61, %v323_v62 }
 0x1a7   :  { %v446_v0 = vmul.f32 -1.442695, %v327_v63 }
 0x1a9   :  { %479 = vpow2.f32 %v446_v0 }
 0x1af   :  { %v480_v1 = vpop.eup %479 }
 0x1b0   :  { %v331_v2 = vadd.f32 1.0, %v480_v1 }
 0x1b2   :  { %481 = vrcp.f32 %v331_v2  ;;  %v343_v6 = vand.u32 2147483648, %v331_v2  ;;  %v341_v8 = vand.u32 2147483647, %v331_v2  ;;  %vm337_vm2 = vweird.f32 %v331_v2 }
 0x1b4   :  { %v344_v10 = vor.u32 1.1754944e-38, %v343_v6  ;;  %vm342_vm5 = vcmp.eq.f32.partialorder %v341_v8, 8.507059e+37 }
 0x1b8   :  { %v482_v3 = vpop.eup %481 }
 0x1b9   :  { %v333_v4 = vmul.f32 %v482_v3, %v331_v2  ;;  %vm338_vm1 = vweird.f32 %v482_v3 }
 0x1ba   :  { %vm339_vm3 = vmor %vm337_vm2, %vm338_vm1 }
 0x1bb   :  { %v334_v5 = vsub.f32 1.0, %v333_v4 }
 0x1bd   :  { %v335_v7 = vmul.f32 %v482_v3, %v334_v5 }
 0x1bf   :  { %v336_v9 = vadd.f32 %v482_v3, %v335_v7 }
 0x1c1   :  { %v340_v11 = vsel %vm339_vm3, %v482_v3, %v336_v9 }
 0x1c2   :  { %v345_v12 = vsel %vm342_vm5, %v344_v10, %v340_v11 }
 0x1c3   :  { %348 = vst.msk [vmem:[%s646_s5] sm:$0xff] %vm347_vm4, %v345_v12 }
 0x1c4   :  { %353 = vsyncpa [#allocation3], 1 }
 0x1c5   :  { %354 = vsyncpa [#allocation5], 1 }
 0x1c6   :  { %355 = vsyncpa [#allocation8], 1 }

</bundles_post_ra>
